<compile_context>
chip_gen: v5e
topology: v5e:2x2
jax: 0.10.0
libtpu: 0.0.40
codegen_flags: <defaults>
</compile_context>

<pallas_src>
import jax
import jax.numpy as jnp
from jax.experimental import pallas as pl
from jax.experimental.pallas import tpu as pltpu


def _spectral_conv1d_kernel(x_ref, cr_ref, ci_ref, wr_ref, wi_ref,
                            dr_ref, di_ref, o_ref):
    # x_ref : (Cin, N)   one batch element
    # cr/ci : (N, M)     truncated forward rDFT basis (real / imag)
    # wr/wi : (Cin, Cout, M) complex spectral weights (real / imag)
    # dr/di : (M, N)     truncated inverse rDFT basis (scaled)
    # o_ref : (Cout, N)
    x = x_ref[...].astype(jnp.float32)

    # Forward truncated real DFT (MXU): (Cin, N) @ (N, M) -> (Cin, M)
    xr = jnp.dot(x, cr_ref[...], preferred_element_type=jnp.float32)
    xi = jnp.dot(x, ci_ref[...], preferred_element_type=jnp.float32)

    # Per-mode complex channel mixing: einsum('im,iom->om') done as a
    # broadcast-multiply + reduce over the input-channel axis (tiny tensor:
    # Cin*Cout*M elements, VPU/XLU work that hides under the MXU matmuls).
    wr = wr_ref[...]
    wi = wi_ref[...]
    xr_b = xr[:, None, :]                        # (Cin, 1, M)
    xi_b = xi[:, None, :]
    yr = jnp.sum(xr_b * wr - xi_b * wi, axis=0)  # (Cout, M)
    yi = jnp.sum(xr_b * wi + xi_b * wr, axis=0)  # (Cout, M)

    # Inverse truncated real DFT (MXU): (Cout, M) @ (M, N) -> (Cout, N)
    y = (jnp.dot(yr, dr_ref[...], preferred_element_type=jnp.float32)
         + jnp.dot(yi, di_ref[...], preferred_element_type=jnp.float32))
    o_ref[...] = y.astype(o_ref.dtype)


def spectral_conv1d_pallas(x, weights_real, weights_imag, modes1):
    """Pallas equivalent of SpectralConv1d.forward(x).

    x             : (B, Cin, N) real
    weights_real  : (Cin, Cout, modes1)  real part of complex weights
    weights_imag  : (Cin, Cout, modes1)  imag part of complex weights
    returns       : (B, Cout, N) real
    """
    B, Cin, N = x.shape
    Cin_w, Cout, M = weights_real.shape
    assert Cin_w == Cin and M == modes1 and modes1 <= N // 2 + 1

    f32 = jnp.float32
    n = jnp.arange(N, dtype=f32)
    k = jnp.arange(M, dtype=f32)

    # Forward rDFT basis (truncated to the first M modes):
    #   X[k] = sum_n x[n] * exp(-2*pi*i*k*n/N)
    ang_fwd = 2.0 * jnp.pi * jnp.outer(n, k) / N          # (N, M)
    cr = jnp.cos(ang_fwd)
    ci = -jnp.sin(ang_fwd)

    # Inverse rDFT basis with Hermitian weighting (DC / Nyquist counted once,
    # all other modes twice) and 1/N normalisation folded in:
    #   y[n] = sum_k s_k/N * (Yr[k]*cos(th) - Yi[k]*sin(th)),  th = 2*pi*k*n/N
    s = jnp.where(k == 0, 1.0, 2.0)
    if N % 2 == 0:
        s = jnp.where(k == (N // 2), 1.0, s)
    ang_inv = 2.0 * jnp.pi * jnp.outer(k, n) / N          # (M, N)
    dr = (s[:, None] * jnp.cos(ang_inv)) / N
    di = -(s[:, None] * jnp.sin(ang_inv)) / N

    out_shape = jax.ShapeDtypeStruct((B, Cout, N), x.dtype)

    # TODO(synk): for very large N, additionally tile the spatial axis of the
    # forward/inverse DFT matmuls (accumulator grid axis) instead of staging
    # full (C, N) planes per step; not needed at FNO-typical sizes.
    return pl.pallas_call(
        _spectral_conv1d_kernel,
        out_shape=out_shape,
        grid_spec=pltpu.PrefetchScalarGridSpec(
            num_scalar_prefetch=0,
            grid=(B,),
            in_specs=[
                pl.BlockSpec((pl.Squeezed(), Cin, N), lambda b: (b, 0, 0)),
                pl.BlockSpec((N, M), lambda b: (0, 0)),
                pl.BlockSpec((N, M), lambda b: (0, 0)),
                pl.BlockSpec((Cin, Cout, M), lambda b: (0, 0, 0)),
                pl.BlockSpec((Cin, Cout, M), lambda b: (0, 0, 0)),
                pl.BlockSpec((M, N), lambda b: (0, 0)),
                pl.BlockSpec((M, N), lambda b: (0, 0)),
            ],
            out_specs=pl.BlockSpec((pl.Squeezed(), Cout, N), lambda b: (b, 0, 0)),
        ),
        compiler_params=pltpu.CompilerParams(
            dimension_semantics=("parallel",),
        ),
    )(x.astype(f32), cr, ci,
      weights_real.astype(f32), weights_imag.astype(f32), dr, di)


class SpectralConv1d:
    """JAX/Pallas port of the PyTorch SpectralConv1d nn.Module."""

    def __init__(self, in_channels, out_channels, modes1, *, key):
        self.in_channels = in_channels
        self.out_channels = out_channels
        self.modes1 = modes1
        self.scale = 1.0 / (in_channels * out_channels)
        kr, ki = jax.random.split(key)
        shape = (in_channels, out_channels, modes1)
        # torch.rand(..., dtype=cfloat): uniform [0,1) real and imag parts.
        self.weights1_real = self.scale * jax.random.uniform(kr, shape, dtype=jnp.float32)
        self.weights1_imag = self.scale * jax.random.uniform(ki, shape, dtype=jnp.float32)

    def __call__(self, x):
        return spectral_conv1d_pallas(x, self.weights1_real, self.weights1_imag,
                                      self.modes1)


def _spectral_conv1d_reference(x, wr, wi, modes1):
    """Pure-JAX reference mirroring the PyTorch forward (rfft/irfft based)."""
    B, Cin, N = x.shape
    Cout = wr.shape[1]
    hp = jax.lax.Precision.HIGHEST
    x_ft = jnp.fft.rfft(x, axis=-1)                      # (B, Cin, N//2+1)
    xr = jnp.real(x_ft[:, :, :modes1]).astype(jnp.float32)
    xi = jnp.imag(x_ft[:, :, :modes1]).astype(jnp.float32)
    yr = (jnp.einsum('bix,iox->box', xr, wr, precision=hp)
          - jnp.einsum('bix,iox->box', xi, wi, precision=hp))
    yi = (jnp.einsum('bix,iox->box', xr, wi, precision=hp)
          + jnp.einsum('bix,iox->box', xi, wr, precision=hp))
    out_ft = jnp.zeros((B, Cout, N // 2 + 1), dtype=jnp.complex64)
    out_ft = out_ft.at[:, :, :modes1].set((yr + 1j * yi).astype(jnp.complex64))
    return jnp.fft.irfft(out_ft, n=N, axis=-1).astype(x.dtype)


if __name__ == "__main__":
    key = jax.random.PRNGKey(0)
    kx, kw = jax.random.split(key)

    # Small shapes consistent with the module: batch=2, channels=4 -> 4,
    # spatial grid N=128 (lane-dense output), modes1=16.
    B, Cin, Cout, N, M = 2, 4, 4, 128, 16
    x = jax.random.normal(kx, (B, Cin, N), dtype=jnp.float32)

    module = SpectralConv1d(Cin, Cout, M, key=kw)
    out = module(x)
    out = jax.block_until_ready(out)

    assert out.shape == (B, Cout, N), out.shape
    assert out.dtype == x.dtype
    assert bool(jnp.all(jnp.isfinite(out)))

    ref = _spectral_conv1d_reference(x, module.weights1_real, module.weights1_imag, M)
    max_abs = float(jnp.max(jnp.abs(out - ref)))
    rel = max_abs / (float(jnp.max(jnp.abs(ref))) + 1e-8)
    assert rel < 1e-2, f"SpectralConv1d mismatch: max_abs={max_abs}, rel={rel}"

    print("KERNEL_OK")
</pallas_src>

<mosaic_0001>
module attributes {stable_mosaic.version = 11 : i64} {
  func.func @_spectral_conv1d_kernel(%arg0: i32, %arg1: memref<1x4x128xf32, #tpu.memory_space<vmem>>, %arg2: memref<128x16xf32, #tpu.memory_space<vmem>>, %arg3: memref<128x16xf32, #tpu.memory_space<vmem>>, %arg4: memref<4x4x16xf32, #tpu.memory_space<vmem>>, %arg5: memref<4x4x16xf32, #tpu.memory_space<vmem>>, %arg6: memref<16x128xf32, #tpu.memory_space<vmem>>, %arg7: memref<16x128xf32, #tpu.memory_space<vmem>>, %arg8: memref<1x4x128xf32, #tpu.memory_space<vmem>>) attributes {dimension_semantics = [#tpu.dimension_semantics<parallel>], iteration_bounds = array<i64: 2>, scalar_prefetch = 0 : i64, scratch_operands = 0 : i64, tpu.core_type = #tpu.core_type<tc>, window_params = [{transform_indices = @transform_0, window_bounds = array<i64: 1, 4, 128>}, {pipeline_mode = #tpu.pipeline_mode<synchronous>, transform_indices = @transform_1, window_bounds = array<i64: 128, 16>}, {pipeline_mode = #tpu.pipeline_mode<synchronous>, transform_indices = @transform_2, window_bounds = array<i64: 128, 16>}, {pipeline_mode = #tpu.pipeline_mode<synchronous>, transform_indices = @transform_3, window_bounds = array<i64: 4, 4, 16>}, {pipeline_mode = #tpu.pipeline_mode<synchronous>, transform_indices = @transform_4, window_bounds = array<i64: 4, 4, 16>}, {pipeline_mode = #tpu.pipeline_mode<synchronous>, transform_indices = @transform_5, window_bounds = array<i64: 16, 128>}, {pipeline_mode = #tpu.pipeline_mode<synchronous>, transform_indices = @transform_6, window_bounds = array<i64: 16, 128>}, {transform_indices = @transform_7, window_bounds = array<i64: 1, 4, 128>}]} {
    %c0 = arith.constant 0 : index
    %c0_0 = arith.constant 0 : index
    %c0_1 = arith.constant 0 : index
    %0 = vector.load %arg1[%c0, %c0_0, %c0_1] : memref<1x4x128xf32, #tpu.memory_space<vmem>>, vector<1x4x128xf32>
    %1 = vector.shape_cast %0 : vector<1x4x128xf32> to vector<4x128xf32>
    %c0_2 = arith.constant 0 : index
    %c0_3 = arith.constant 0 : index
    %2 = vector.load %arg2[%c0_2, %c0_3] : memref<128x16xf32, #tpu.memory_space<vmem>>, vector<128x16xf32>
    %cst = arith.constant dense<0.000000e+00> : vector<4x16xf32>
    %3 = tpu.matmul %1, %2, %cst {dimension_numbers = #tpu.dot_dimension_numbers<[1], [0], [0], [1], [0, 0, 1, 1], [], []>} : vector<4x128xf32>, vector<128x16xf32>, vector<4x16xf32> -> vector<4x16xf32>
    %c0_4 = arith.constant 0 : index
    %c0_5 = arith.constant 0 : index
    %4 = vector.load %arg3[%c0_4, %c0_5] : memref<128x16xf32, #tpu.memory_space<vmem>>, vector<128x16xf32>
    %cst_6 = arith.constant dense<0.000000e+00> : vector<4x16xf32>
    %5 = tpu.matmul %1, %4, %cst_6 {dimension_numbers = #tpu.dot_dimension_numbers<[1], [0], [0], [1], [0, 0, 1, 1], [], []>} : vector<4x128xf32>, vector<128x16xf32>, vector<4x16xf32> -> vector<4x16xf32>
    %c0_7 = arith.constant 0 : index
    %c0_8 = arith.constant 0 : index
    %c0_9 = arith.constant 0 : index
    %6 = vector.load %arg4[%c0_7, %c0_8, %c0_9] : memref<4x4x16xf32, #tpu.memory_space<vmem>>, vector<4x4x16xf32>
    %c0_10 = arith.constant 0 : index
    %c0_11 = arith.constant 0 : index
    %c0_12 = arith.constant 0 : index
    %7 = vector.load %arg5[%c0_10, %c0_11, %c0_12] : memref<4x4x16xf32, #tpu.memory_space<vmem>>, vector<4x4x16xf32>
    %8 = vector.shape_cast %3 : vector<4x16xf32> to vector<4x1x16xf32>
    %9 = vector.shape_cast %5 : vector<4x16xf32> to vector<4x1x16xf32>
    %10 = vector.broadcast %8 : vector<4x1x16xf32> to vector<4x4x16xf32>
    %11 = arith.mulf %10, %6 : vector<4x4x16xf32>
    %12 = vector.broadcast %9 : vector<4x1x16xf32> to vector<4x4x16xf32>
    %13 = arith.mulf %12, %7 : vector<4x4x16xf32>
    %14 = arith.subf %11, %13 : vector<4x4x16xf32>
    %cst_13 = arith.constant dense<0.000000e+00> : vector<4x16xf32>
    %15 = vector.multi_reduction <add>, %14, %cst_13 [0] : vector<4x4x16xf32> to vector<4x16xf32>
    %16 = vector.broadcast %8 : vector<4x1x16xf32> to vector<4x4x16xf32>
    %17 = arith.mulf %16, %7 : vector<4x4x16xf32>
    %18 = vector.broadcast %9 : vector<4x1x16xf32> to vector<4x4x16xf32>
    %19 = arith.mulf %18, %6 : vector<4x4x16xf32>
    %20 = arith.addf %17, %19 : vector<4x4x16xf32>
    %cst_14 = arith.constant dense<0.000000e+00> : vector<4x16xf32>
    %21 = vector.multi_reduction <add>, %20, %cst_14 [0] : vector<4x4x16xf32> to vector<4x16xf32>
    %c0_15 = arith.constant 0 : index
    %c0_16 = arith.constant 0 : index
    %22 = vector.load %arg6[%c0_15, %c0_16] : memref<16x128xf32, #tpu.memory_space<vmem>>, vector<16x128xf32>
    %cst_17 = arith.constant dense<0.000000e+00> : vector<4x128xf32>
    %23 = tpu.matmul %15, %22, %cst_17 {dimension_numbers = #tpu.dot_dimension_numbers<[1], [0], [0], [1], [0, 0, 1, 1], [], []>} : vector<4x16xf32>, vector<16x128xf32>, vector<4x128xf32> -> vector<4x128xf32>
    %c0_18 = arith.constant 0 : index
    %c0_19 = arith.constant 0 : index
    %24 = vector.load %arg7[%c0_18, %c0_19] : memref<16x128xf32, #tpu.memory_space<vmem>>, vector<16x128xf32>
    %cst_20 = arith.constant dense<0.000000e+00> : vector<4x128xf32>
    %25 = tpu.matmul %21, %24, %cst_20 {dimension_numbers = #tpu.dot_dimension_numbers<[1], [0], [0], [1], [0, 0, 1, 1], [], []>} : vector<4x16xf32>, vector<16x128xf32>, vector<4x128xf32> -> vector<4x128xf32>
    %26 = arith.addf %23, %25 : vector<4x128xf32>
    %c0_21 = arith.constant 0 : index
    %c0_22 = arith.constant 0 : index
    %c0_23 = arith.constant 0 : index
    %27 = vector.load %arg8[%c0_21, %c0_22, %c0_23] : memref<1x4x128xf32, #tpu.memory_space<vmem>>, vector<1x4x128xf32>
    %28 = vector.shape_cast %27 : vector<1x4x128xf32> to vector<4x128xf32>
    %29 = vector.shape_cast %26 : vector<4x128xf32> to vector<1x4x128xf32>
    tpu.vector_store %arg8[%c0_21, %c0_22, %c0_23], %29 {strides = array<i32>} : memref<1x4x128xf32, #tpu.memory_space<vmem>>, vector<1x4x128xf32>,
    return
  }
  func.func @transform_0(%arg0: i32) -> (i32, i32, i32) {
    %c0_i32 = arith.constant 0 : i32
    %c0_i32_0 = arith.constant 0 : i32
    %c0_i32_1 = arith.constant 0 : i32
    return %arg0, %c0_i32, %c0_i32_0 : i32, i32, i32
  }
  func.func @transform_1(%arg0: i32) -> (i32, i32) {
    %c0_i32 = arith.constant 0 : i32
    %c0_i32_0 = arith.constant 0 : i32
    %c0_i32_1 = arith.constant 0 : i32
    return %c0_i32, %c0_i32_0 : i32, i32
  }
  func.func @transform_2(%arg0: i32) -> (i32, i32) {
    %c0_i32 = arith.constant 0 : i32
    %c0_i32_0 = arith.constant 0 : i32
    %c0_i32_1 = arith.constant 0 : i32
    return %c0_i32, %c0_i32_0 : i32, i32
  }
  func.func @transform_3(%arg0: i32) -> (i32, i32, i32) {
    %c0_i32 = arith.constant 0 : i32
    %c0_i32_0 = arith.constant 0 : i32
    %c0_i32_1 = arith.constant 0 : i32
    %c0_i32_2 = arith.constant 0 : i32
    return %c0_i32, %c0_i32_0, %c0_i32_1 : i32, i32, i32
  }
  func.func @transform_4(%arg0: i32) -> (i32, i32, i32) {
    %c0_i32 = arith.constant 0 : i32
    %c0_i32_0 = arith.constant 0 : i32
    %c0_i32_1 = arith.constant 0 : i32
    %c0_i32_2 = arith.constant 0 : i32
    return %c0_i32, %c0_i32_0, %c0_i32_1 : i32, i32, i32
  }
  func.func @transform_5(%arg0: i32) -> (i32, i32) {
    %c0_i32 = arith.constant 0 : i32
    %c0_i32_0 = arith.constant 0 : i32
    %c0_i32_1 = arith.constant 0 : i32
    return %c0_i32, %c0_i32_0 : i32, i32
  }
  func.func @transform_6(%arg0: i32) -> (i32, i32) {
    %c0_i32 = arith.constant 0 : i32
    %c0_i32_0 = arith.constant 0 : i32
    %c0_i32_1 = arith.constant 0 : i32
    return %c0_i32, %c0_i32_0 : i32, i32
  }
  func.func @transform_7(%arg0: i32) -> (i32, i32, i32) {
    %c0_i32 = arith.constant 0 : i32
    %c0_i32_0 = arith.constant 0 : i32
    %c0_i32_1 = arith.constant 0 : i32
    return %arg0, %c0_i32, %c0_i32_0 : i32, i32, i32
  }
}

</mosaic_0001>

<bundles_post_ra>
// kernel: tpu_custom_call.1
= control target key start
LH: loop header
LB: loop body
LE: loop exit
PB: predicated region body
PF: predicated region fallthrough
CT: control target
= control target key end

     0   :  { %12 = vsyncpa [#allocation3], 0  ;;  %s925_s0 = inlined_call_operand.vmem [shape: f32[2,4,128], index: 0, kind: input, shape index: {}]   ;;  %s926_s1 = inlined_call_operand.vmem [shape: f32[128,16], index: 1, kind: input, shape index: {}]   ;;  %s927_s2 = inlined_call_operand.vmem [shape: f32[128,16], index: 2, kind: input, shape index: {}]   ;;  %s928_s3 = inlined_call_operand.vmem [shape: f32[4,4,16], index: 3, kind: input, shape index: {}]   ;;  %s929_s4 = inlined_call_operand.vmem [shape: f32[4,4,16], index: 4, kind: input, shape index: {}]   ;;  %s930_s5 = inlined_call_operand.vmem [shape: f32[16,128], index: 5, kind: input, shape index: {}]   ;;  %s931_s6 = inlined_call_operand.vmem [shape: f32[16,128], index: 6, kind: input, shape index: {}]   ;;  %s932_s7 = inlined_call_operand.hbm [shape: f32[2,4,128], index: 7, kind: output, shape index: {}]  }
   0x1   :  { %14 = vsyncpa [#allocation3 + $0x1], 0  ;;  %s700_s24 = smov 0   ;;  %s702_s25 = smov 0  }
   0x2   :  { %s704_s26 = smov 0   ;;  %s706_s27 = smov 0  }
   0x3 LB: > { %s721_s28 = sadd.s32 4294967295, %s658_s27   ;;  %s545_s29 = sadd.s32 4294967294, %s658_s27   ;;  %s658_s27 = sphi %s706_s27, %s938_s27   ;;  %s654_s26 = sphi %s704_s26, %s937_s26   ;;  %s650_s25 = sphi %s702_s25, %s936_s25   ;;  %s646_s24 = sphi %s700_s24, %s935_s24  }
   0x4   : > { %s725_s30 = sadd.s32 1, %s658_s27   ;;  %s179_s8 = sadd.s32 1, %s654_s26 }
   0x5   : > { %s176_s9 = ssub.s32 %s658_s27, %s725_s30  ;;  %p189_p0 = scmp.ne.s32.totalorder %s654_s26, %s650_s25 }
   0x6   : > { %p177_p1 = scmp.eq.s32.totalorder %s176_s9, 0  ;;  %p190_p2 = scmp.eq.s32.totalorder %s721_s28, 1 }
   0x7   : > { %p195_p3 = scmp.ne.s32.totalorder %s650_s25, %s646_s24  ;;  %p196_p4 = scmp.eq.s32.totalorder %s545_s29, 1 }
   0x8   : > { %s736_s10 = scalar_select %p177_p1, %s654_s26, %s179_s8  }
   0x9   : > { %p738_p5 = por %p190_p2, %p189_p0  ;;  %p742_p6 = por %p196_p4, %p195_p3 }
   0xa   : > { %p548_p7 = scmp.ge.s32.totalorder %s658_s27, 1  ;;  %p239_p8 = scmp.lt.s32.totalorder %s658_s27, 3 }
   0xc   : > { %p240_p9 = pnand %p548_p7, %p239_p8 }
   0xd   : > { %p270_p10 = scmp.lt.s32.totalorder (!%p240_p9), %s721_s28, 1  ;;  %s267_s22 = sand.u32 (!%p240_p9), 1, %s650_s25  }
   0xe   : > { %243 = sbr.rel (%p240_p9) target bundleno = 331 (0x14b), region = 48  ;;  %s549_s23 = sshll.u32 (!%p240_p9), %s267_s22, 2 }
   0xf   : > { %s554_s8 = sshll.u32 (!%p240_p9), %s721_s28, 2  ;;  %s471_s18 = scalar_lea.sflag (!%p240_p9), [#allocation3], %s267_s22 }
  0x10   : > { %s481_s14 = scalar_lea.hbm (!%p240_p9), %s932_s7, %s554_s8 }
  0x11   : > { %s485_s17 = sshll.u32 (!%p240_p9), %s481_s14, 4  ;;  %s486_s17 = int_to_ptr.hbm [resolvable:$true] %s485_s17 }
  0x12   : > { %s610_s19 = sshra.s32 (!%p240_p9), %s486_s17, 4  ;;  %s611_s19 = int_to_ptr.hbm [resolvable:$true] %s610_s19 }
  0x13   : > { %v290_v0 = vld [vmem:[%s926_s1 + $0x78] sm:$0xff]  ;;  %v289_v2 = vld [vmem:[%s926_s1 + $0x70] sm:$0xff]  ;;  %v288_v4 = vld [vmem:[%s926_s1 + $0x68] sm:$0xff]  ;;  %s271_s15 = scalar_select %p270_p10, %s721_s28, 1  ;;  %vm391_vm0 = vcmask 125952   ;;  %vm422_vm1 = vcmask 130048  }
  0x14   : > { %v326_v1 = vld [vmem:[%s927_s2 + $0x78] sm:$0xff]  ;;  %291 = vmatpush.msra.mxu0 %v290_v0  ;;  %v325_v3 = vld [vmem:[%s927_s2 + $0x70] sm:$0xff]  ;;  %v324_v5 = vld [vmem:[%s927_s2 + $0x68] sm:$0xff]  ;;  %s612_s20 = scalar_lea.hbm %s611_s19, 4  ;;  %p617_p0 = scmp.lt.s32.totalorder %s611_s19, %s932_s7 }
  0x15   : > { %327 = vmatpush.msra.mxu1 %v326_v1  ;;  %v287_v6 = vld [vmem:[%s926_s1 + $0x60] sm:$0xff]  ;;  %v286_v8 = vld [vmem:[%s926_s1 + $0x58] sm:$0xff]  ;;  %v285_v10 = vld [vmem:[%s926_s1 + $0x50] sm:$0xff]  ;;  %s550_s29 = sshll.u32 %s271_s15, 2  ;;  %p613_p11 = scmp.ne.s32.totalorder %s611_s19, %s612_s20 }
  0x16   : > { %292 = vmatpush.msra.mxu0 %v289_v2  ;;  %v323_v7 = vld [vmem:[%s927_s2 + $0x60] sm:$0xff]  ;;  %v322_v9 = vld [vmem:[%s927_s2 + $0x58] sm:$0xff]  ;;  %v321_v11 = vld [vmem:[%s927_s2 + $0x50] sm:$0xff]  ;;  %s273_s21 = scalar_lea.vmem %s925_s0, %s550_s29  ;;  %s269_s29 = scalar_lea.vmem [#allocation2], %s549_s23 }
  0x17   : > { %328 = vmatpush.msra.mxu1 %v325_v3  ;;  %v284_v12 = vld [vmem:[%s926_s1 + $0x48] sm:$0xff]  ;;  %v283_v14 = vld [vmem:[%s926_s1 + $0x40] sm:$0xff]  ;;  %v282_v16 = vld [vmem:[%s926_s1 + $0x38] sm:$0xff]  ;;  %s483_s16 = sshll.u32 %s269_s29, 4  ;;  %p614_p12 = pnand %p613_p11, %p738_p5  ;;  %s484_s16 = int_to_ptr.vmem [resolvable:$true] %s483_s16 }
  0x18   : > { %293 = vmatpush.msra.mxu0 %v288_v4  ;;  %v320_v13 = vld [vmem:[%s927_s2 + $0x48] sm:$0xff]  ;;  %v319_v15 = vld [vmem:[%s927_s2 + $0x40] sm:$0xff]  ;;  %v318_v17 = vld [vmem:[%s927_s2 + $0x38] sm:$0xff] }
  0x19   : > { %329 = vmatpush.msra.mxu1 %v324_v5  ;;  %v281_v18 = vld [vmem:[%s926_s1 + $0x30] sm:$0xff]  ;;  %v280_v20 = vld [vmem:[%s926_s1 + $0x28] sm:$0xff]  ;;  %v279_v22 = vld [vmem:[%s926_s1 + $0x20] sm:$0xff]  ;;  %p615_p13 = pneg %p614_p12 }
  0x1a   : > { %294 = vmatpush.msra.mxu0 %v287_v6  ;;  %v317_v19 = vld [vmem:[%s927_s2 + $0x30] sm:$0xff]  ;;  %v316_v21 = vld [vmem:[%s927_s2 + $0x28] sm:$0xff]  ;;  %v315_v23 = vld [vmem:[%s927_s2 + $0x20] sm:$0xff] }
  0x1b   : > { %330 = vmatpush.msra.mxu1 %v323_v7  ;;  %v278_v24 = vld [vmem:[%s926_s1 + $0x18] sm:$0xff]  ;;  %v277_v26 = vld [vmem:[%s926_s1 + $0x10] sm:$0xff]  ;;  %v276_v28 = vld [vmem:[%s926_s1 + $0x8] sm:$0xff] }
  0x1c   : > { %295 = vmatpush.msra.mxu0 %v286_v8  ;;  %v314_v25 = vld [vmem:[%s927_s2 + $0x18] sm:$0xff]  ;;  %v313_v27 = vld [vmem:[%s927_s2 + $0x10] sm:$0xff]  ;;  %v312_v29 = vld [vmem:[%s927_s2 + $0x8] sm:$0xff] }
  0x1d   : > { %331 = vmatpush.msra.mxu1 %v322_v9  ;;  %v275_v30 = vld [vmem:[%s926_s1] sm:$0xff]  ;;  %v421_v33 = vld [vmem:[%s931_s6 + $0x8] sm:$0xff] }
  0x1e   : > { %296 = vmatpush.msra.mxu0 %v285_v10  ;;  %v311_v31 = vld [vmem:[%s927_s2] sm:$0xff]  ;;  %v419_v34 = vld [vmem:[%s930_s5 + $0x8] sm:$0xff]  ;;  %440 = vmatpush.msra.mxu2 %v421_v33 }
  0x1f   : > { %332 = vmatpush.msra.mxu1 %v321_v11  ;;  %v274_v32 = vld [vmem:[%s273_s21] sm:$0xf]  ;;  %463 = vmatpush.msra.mxu3 %v419_v34  ;;  %v348_v39 = vld [vmem:[%s928_s3 + $0x4] sm:$0xf]  ;;  %v349_v40 = vld [vmem:[%s928_s3 + $0x8] sm:$0xf] }
  0x20   : > { %297 = vmatpush.msra.mxu0 %v284_v12  ;;  %v420_v35 = vld [vmem:[%s931_s6] sm:$0xff]  ;;  %v350_v41 = vld [vmem:[%s928_s3 + $0xc] sm:$0xf]  ;;  %v353_v49 = vld [vmem:[%s929_s4 + $0x8] sm:$0xf]  ;;  %s616_s21 = scalar_lea.hbm %s932_s7, 8 }
  0x21   : > { %333 = vmatpush.msra.mxu1 %v320_v13  ;;  %v418_v36 = vld [vmem:[%s930_s5] sm:$0xff]  ;;  %441 = vmatpush.msra.mxu2 %v420_v35  ;;  %v354_v54 = vld [vmem:[%s929_s4 + $0xc] sm:$0xf]  ;;  %p618_p1 = scmp.lt.s32.totalorder %s616_s21, %s612_s20 }
  0x22   : > { %298 = vmatpush.msra.mxu0 %v283_v14  ;;  %464 = vmatpush.msra.mxu3 %v418_v36  ;;  %v347_v37 = vld [vmem:[%s928_s3] sm:$0xf]  ;;  %v352_v44 = vld [vmem:[%s929_s4 + $0x4] sm:$0xf] }
  0x23   : > { %334 = vmatpush.msra.mxu1 %v319_v15  ;;  %v351_v42 = vld [vmem:[%s929_s4] sm:$0xf]  ;;  %p619_p2 = por %p618_p1, %p617_p0 }
  0x24   : > { %299 = vmatpush.msra.mxu0 %v282_v16 }
  0x25   : > { %335 = vmatpush.msra.mxu1 %v318_v17  ;;  %p620_p3 = pnand %p619_p2, %p615_p13 }
  0x26   : > { %300 = vmatpush.msra.mxu0 %v281_v18 }
  0x27   : > { %336 = vmatpush.msra.mxu1 %v317_v19 }
  0x28   : > { %301 = vmatpush.msra.mxu0 %v280_v20 }
  0x29   : > { %337 = vmatpush.msra.mxu1 %v316_v21 }
  0x2a   : > { %302 = vmatpush.msra.mxu0 %v279_v22 }
  0x2b   : > { %338 = vmatpush.msra.mxu1 %v315_v23 }
  0x2c   : > { %303 = vmatpush.msra.mxu0 %v278_v24 }
  0x2d   : > { %339 = vmatpush.msra.mxu1 %v314_v25 }
  0x2e   : > { %304 = vmatpush.msra.mxu0 %v277_v26 }
  0x2f   : > { %340 = vmatpush.msra.mxu1 %v313_v27 }
  0x30   : > { %305 = vmatpush.msra.mxu0 %v276_v28 }
  0x31   : > { %341 = vmatpush.msra.mxu1 %v312_v29 }
  0x32   : > { %306 = vmatpush.msra.mxu0 %v275_v30 }
  0x33   : > { %342 = vmatpush.msra.mxu1 %v311_v31  ;;  %307 = vmatmul.f32.vlgmr.msra.gmra.mxu0 %v274_v32 }
  0x34   : > { %343 = vmatmul.f32.vlgmr.msra.gmra.mxu1 %v274_v32 }
  0xb0   : > { %v308_v38 = vpop.f32.mrf.mxu0 }
  0xb1   : > { %v344_v43 = vpop.f32.mrf.mxu1  ;;  %v356_v45 = vrot.slane %v308_v38, 1  ;;  %v357_v46 = vrot.slane %v308_v38, 2  ;;  %v358_v47 = vrot.slane %v308_v38, 3  ;;  %v363_v48 = vperm.slane %v308_v38, 0 }
  0xb2   : > { %v360_v50 = vrot.slane %v344_v43, 1  ;;  %v361_v51 = vrot.slane %v344_v43, 2  ;;  %v362_v52 = vrot.slane %v344_v43, 3  ;;  %v375_v53 = vperm.slane %v344_v43, 0 }
  0xb3   : > { %v364_v55 = vperm.slane %v356_v45, 0  ;;  %v365_v56 = vperm.slane %v357_v46, 0  ;;  %v366_v57 = vperm.slane %v358_v47, 0  ;;  %v371_v58 = vmul.f32 %v363_v48, %v347_v37 }
  0xb4   : > { %v399_v59 = vmul.f32 %v363_v48, %v351_v42  ;;  %v376_v60 = vperm.slane %v360_v50, 0  ;;  %v377_v61 = vperm.slane %v361_v51, 0  ;;  %v378_v62 = vperm.slane %v362_v52, 0 }
  0xb5   : > { %v372_v63 = vmul.f32 %v364_v55, %v348_v39  ;;  %v373_v0 = vmul.f32 %v365_v56, %v349_v40  ;;  %v374_v1 = vmul.f32 %v366_v57, %v350_v41  ;;  %v400_v2 = vmul.f32 %v364_v55, %v352_v44 }
  0xb6   : > { %v401_v3 = vmul.f32 %v365_v56, %v353_v49  ;;  %v402_v4 = vmul.f32 %v366_v57, %v354_v54  ;;  %v383_v5 = vmul.f32 %v375_v53, %v351_v42  ;;  %v384_v6 = vmul.f32 %v376_v60, %v352_v44 }
  0xb7   : > { %v385_v7 = vmul.f32 %v377_v61, %v353_v49  ;;  %v386_v8 = vmul.f32 %v378_v62, %v354_v54  ;;  %v403_v9 = vmul.f32 %v375_v53, %v347_v37  ;;  %v404_v10 = vmul.f32 %v376_v60, %v348_v39 }
  0xb8   : > { %v387_v11 = vsub.f32 %v371_v58, %v383_v5  ;;  %v388_v12 = vsub.f32 %v372_v63, %v384_v6  ;;  %v405_v13 = vmul.f32 %v377_v61, %v349_v40  ;;  %v406_v14 = vmul.f32 %v378_v62, %v350_v41 }
  0xb9   : > { %v389_v15 = vsub.f32 %v373_v0, %v385_v7  ;;  %v407_v16 = vadd.f32 %v403_v9, %v399_v59  ;;  %v408_v17 = vadd.f32 %v404_v10, %v400_v2  ;;  %v390_v19 = vsub.f32 %v374_v1, %v386_v8 }
  0xba   : > { %v409_v18 = vadd.f32 %v405_v13, %v401_v3  ;;  %v392_v20 = vsel %vm391_vm0, %v387_v11, 0.0  ;;  %v393_v21 = vsel %vm391_vm0, %v388_v12, 0.0  ;;  %v410_v22 = vadd.f32 %v406_v14, %v402_v4 }
  0xbb   : > { %v411_v23 = vsel %vm391_vm0, %v407_v16, 0.0  ;;  %v412_v24 = vsel %vm391_vm0, %v408_v17, 0.0  ;;  %v394_v25 = vadd.f32 %v393_v21, %v392_v20  ;;  %v395_v27 = vsel %vm391_vm0, %v389_v15, 0.0 }
  0xbc   : > { %v413_v26 = vadd.f32 %v412_v24, %v411_v23  ;;  %v414_v28 = vsel %vm391_vm0, %v409_v18, 0.0  ;;  %v397_v31 = vsel %vm391_vm0, %v390_v19, 0.0  ;;  %v416_v32 = vsel %vm391_vm0, %v410_v22, 0.0 }
  0xbd   : > { %v396_v29 = vadd.f32 %v395_v27, %v394_v25 }
  0xbe   : > { %v415_v30 = vadd.f32 %v414_v28, %v413_v26 }
  0xbf   : > { %v398_v33 = vadd.f32 %v397_v31, %v396_v29 }
  0xc0   : > { %v417_v34 = vadd.f32 %v416_v32, %v415_v30 }
  0xc1   : > { %552 = vmatmul.msk.f32.vlgmr.msra.gmra.mxu3 %vm422_vm1, %v398_v33 }
  0xc2   : > { %551 = vmatmul.msk.f32.vlgmr.msra.gmra.mxu2 %vm422_vm1, %v417_v34 }
 0x144   : > { %v466_v35 = vpop.f32.mrf.mxu3 }
 0x145   : > { %v443_v36 = vpop.f32.mrf.mxu2 }
 0x146   : > { %v467_v37 = vadd.f32 %v466_v35, %v443_v36 }
 0x148   : > { %469 = vst [vmem:[%s269_s29] sm:$0xf] %v467_v37 }
 0x149   : > { %623 = shalt.err (!%p620_p3)
}
 0x14a   : > { %557 = dma.vmem_to_hbm [thread:$0]  (%p738_p5), %s484_s16, 64, %s486_s17, %s471_s18  }
 0x14b PF: > { %p563_p4 = scmp.ge.s32.totalorder %s658_s27, 2  ;;  %s497_s22 = sand.u32 1, %s646_s24  }
 0x14c   : > { %s498_s9 = scalar_lea.sflag [#allocation3], %s497_s22 }
 0x14d   : > { %p560_p7 = pnand %p563_p4, %p742_p6 }
 0x14f   : > { %p561_p8 = pneg %p560_p7 }
 0x151   : > { %641 = dma.done.wait (%p561_p8), %s498_s9, 64  }
 0x152   : > { %643 = vsyncadd (%p561_p8), %s498_s9, 4294967232  ;;  %p17_p9 = scmp.ge.s32.totalorder %s725_s30, 4   ;;  %s935_s24 = smov %s650_s25 }
 0x153   : > { %s936_s25 = smov %s654_s26  ;;  %s937_s26 = smov %s736_s10 }
 0x154   : > { %s938_s27 = smov %s725_s30  ;;  %19 = sbr.rel (!%p17_p9) target bundleno = 3 (0x3), region = 83 }
 0x159   :  { %504 = vsyncpa [#allocation3], 1 }
 0x15a   :  { %506 = vsyncpa [#allocation3 + $0x1], 1 }

</bundles_post_ra>
